<compile_context>
chip_gen: v7x
topology: tpu7x:2x2x1
jax: 0.10.0
libtpu: 0.0.40
codegen_flags: <defaults>
</compile_context>

<pallas_src>
import functools

import jax
import jax.numpy as jnp
from jax import lax
from jax.experimental import pallas as pl
from jax.experimental.pallas import tpu as pltpu


# ------------------------------- helpers ------------------------------------

def _round_up(x, m):
    return (x + m - 1) // m * m


def _pick_tile(total, target, align):
    """Largest multiple of `align` that divides `total` and is <= target,
    else the whole axis (full-extent blocks are always legal)."""
    if total <= target:
        return total
    t = (target // align) * align
    while t >= align:
        if total % t == 0:
            return t
        t -= align
    return total


# ------------------------------ Pallas kernels ------------------------------

def _conv_stats_kernel(p_ref, w_ref, o_ref, sum_ref, sq_ref, acc_ref):
    """grid = (N, nS, nK). p:(1,ts,tk) w:(tk,Cp) o:(1,ts,Cp) sum/sq:(1,1,Cp)."""
    s = pl.program_id(1)
    k = pl.program_id(2)
    nk = pl.num_programs(2)

    @pl.when(k == 0)
    def _():
        acc_ref[...] = jnp.zeros_like(acc_ref)

    @pl.when((s == 0) & (k == 0))
    def _():
        # stats output blocks stay resident across (s, k) -> accumulate in-place
        sum_ref[...] = jnp.zeros_like(sum_ref)
        sq_ref[...] = jnp.zeros_like(sq_ref)

    acc_ref[...] += jnp.dot(p_ref[0], w_ref[...],
                            preferred_element_type=jnp.float32)

    @pl.when(k == nk - 1)
    def _():
        tile = acc_ref[...]                               # (ts, Cp) f32
        o_ref[0] = tile
        sum_ref[0] = sum_ref[0] + jnp.sum(tile, axis=0, keepdims=True)
        sq_ref[0] = sq_ref[0] + jnp.sum(tile * tile, axis=0, keepdims=True)


def _conv_lrelu_kernel(p_ref, w_ref, o_ref, acc_ref, *, slope):
    """normalize=False path: conv + LeakyReLU fused epilogue."""
    k = pl.program_id(2)
    nk = pl.num_programs(2)

    @pl.when(k == 0)
    def _():
        acc_ref[...] = jnp.zeros_like(acc_ref)

    acc_ref[...] += jnp.dot(p_ref[0], w_ref[...],
                            preferred_element_type=jnp.float32)

    @pl.when(k == nk - 1)
    def _():
        t = acc_ref[...]
        o_ref[0] = jnp.where(t > 0, t, slope * t)


def _norm_lrelu_kernel(y_ref, sum_ref, sq_ref, o_ref, *, inv_s, eps, slope):
    """InstanceNorm (affine=False, biased var) + LeakyReLU, tiled over S."""
    x = y_ref[0]                                          # (ts, Cp) f32
    mean = sum_ref[0] * inv_s                             # (1, Cp)
    var = jnp.maximum(sq_ref[0] * inv_s - mean * mean, 0.0)
    inv_std = lax.rsqrt(var + eps)                        # EUP slot
    y = (x - mean) * inv_std
    o_ref[0] = jnp.where(y > 0, y, slope * y)


# --------------------------------- wrapper ----------------------------------

def unet_down(x, weight, *, stride=2, normalize=True):
    """x: (N, Cin, D, H, W) f32, weight: (Cout, Cin, 3, 3, 3) f32."""
    N, Cin, D, H, W = x.shape
    Cout = weight.shape[0]
    k, pad = 3, 1
    Do = (D + 2 * pad - k) // stride + 1
    Ho = (H + 2 * pad - k) // stride + 1
    Wo = (W + 2 * pad - k) // stride + 1
    S = Do * Ho * Wo
    K = Cin * k * k * k

    Kp = _round_up(K, 128)          # lane-aligned contraction dim
    Coutp = _round_up(Cout, 128)    # lane-dense output channels

    ts = _pick_tile(S, 512, 8)      # S tile (sublane axis of matmul)
    tk = _pick_tile(Kp, 512, 128)   # K tile
    nS = S // ts
    nK = Kp // tk

    # --- im2col glue (plain JAX): (N, S, Kp), K order = (kd, kh, kw, cin) ---
    # TODO(synk): fold the 27 taps into the kernel to avoid this HBM blow-up.
    x_ndhwc = jnp.transpose(x, (0, 2, 3, 4, 1)).astype(jnp.float32)
    xp = jnp.pad(x_ndhwc, ((0, 0), (pad, pad), (pad, pad), (pad, pad), (0, 0)))
    taps = []
    for kd in range(k):
        for kh in range(k):
            for kw in range(k):
                taps.append(xp[:,
                               kd:kd + stride * Do:stride,
                               kh:kh + stride * Ho:stride,
                               kw:kw + stride * Wo:stride, :])
    patches = jnp.concatenate(taps, axis=-1).reshape(N, S, K)
    patches = jnp.pad(patches, ((0, 0), (0, 0), (0, Kp - K)))

    w2 = jnp.transpose(weight.astype(jnp.float32), (2, 3, 4, 1, 0)).reshape(K, Cout)
    w2 = jnp.pad(w2, ((0, Kp - K), (0, Coutp - Cout)))    # (Kp, Coutp)

    vmem_limit = 32 * 1024 * 1024
    cost = pl.CostEstimate(
        flops=2 * N * S * Kp * Coutp,
        transcendentals=0,
        bytes_accessed=4 * (N * S * Kp + Kp * Coutp + N * S * Coutp))

    p_spec = pl.BlockSpec((1, ts, tk), lambda n, s, kk: (n, s, kk))
    w_spec = pl.BlockSpec((tk, Coutp), lambda n, s, kk: (kk, 0))
    o_spec = pl.BlockSpec((1, ts, Coutp), lambda n, s, kk: (n, s, 0))

    if normalize:
        stat_spec = pl.BlockSpec((1, 1, Coutp), lambda n, s, kk: (n, 0, 0))
        conv, sums, sqs = pl.pallas_call(
            _conv_stats_kernel,
            grid=(N, nS, nK),
            in_specs=[p_spec, w_spec],
            out_specs=(o_spec, stat_spec, stat_spec),
            out_shape=(jax.ShapeDtypeStruct((N, S, Coutp), jnp.float32),
                       jax.ShapeDtypeStruct((N, 1, Coutp), jnp.float32),
                       jax.ShapeDtypeStruct((N, 1, Coutp), jnp.float32)),
            scratch_shapes=[pltpu.VMEM((ts, Coutp), jnp.float32)],
            compiler_params=pltpu.CompilerParams(
                # stats outputs are resident across s and k -> arbitrary
                dimension_semantics=("parallel", "arbitrary", "arbitrary"),
                vmem_limit_bytes=vmem_limit),
            cost_estimate=cost,
        )(patches, w2)

        out = pl.pallas_call(
            functools.partial(_norm_lrelu_kernel,
                              inv_s=1.0 / S, eps=1e-5, slope=0.2),
            grid=(N, nS),
            in_specs=[pl.BlockSpec((1, ts, Coutp), lambda n, s: (n, s, 0)),
                      pl.BlockSpec((1, 1, Coutp), lambda n, s: (n, 0, 0)),
                      pl.BlockSpec((1, 1, Coutp), lambda n, s: (n, 0, 0))],
            out_specs=pl.BlockSpec((1, ts, Coutp), lambda n, s: (n, s, 0)),
            out_shape=jax.ShapeDtypeStruct((N, S, Coutp), jnp.float32),
            input_output_aliases={0: 0},      # reuse the conv buffer
            compiler_params=pltpu.CompilerParams(
                dimension_semantics=("parallel", "parallel"),
                vmem_limit_bytes=vmem_limit),
        )(conv, sums, sqs)
    else:
        out = pl.pallas_call(
            functools.partial(_conv_lrelu_kernel, slope=0.2),
            grid=(N, nS, nK),
            in_specs=[p_spec, w_spec],
            out_specs=o_spec,
            out_shape=jax.ShapeDtypeStruct((N, S, Coutp), jnp.float32),
            scratch_shapes=[pltpu.VMEM((ts, Coutp), jnp.float32)],
            compiler_params=pltpu.CompilerParams(
                dimension_semantics=("parallel", "parallel", "arbitrary"),
                vmem_limit_bytes=vmem_limit),
            cost_estimate=cost,
        )(patches, w2)

    # dropout=0.0 in the module -> no-op (eval semantics).
    out = out[:, :, :Cout]                    # drop channel padding
    out = jnp.transpose(out, (0, 2, 1))       # (N, Cout, S) -> PyTorch layout
    return out.reshape(N, Cout, Do, Ho, Wo)


# ---------------------------- pure-JAX reference -----------------------------

def unet_down_ref(x, weight, *, stride=2):
    conv = lax.conv_general_dilated(
        x, weight, window_strides=(stride,) * 3, padding=[(1, 1)] * 3,
        dimension_numbers=("NCDHW", "OIDHW", "NCDHW"))
    mean = jnp.mean(conv, axis=(2, 3, 4), keepdims=True)
    var = jnp.mean((conv - mean) ** 2, axis=(2, 3, 4), keepdims=True)
    y = (conv - mean) * lax.rsqrt(var + 1e-5)
    return jnp.where(y > 0, y, 0.2 * y)


# ----------------------------------- main ------------------------------------

if __name__ == "__main__":
    key = jax.random.PRNGKey(0)
    kx, kw = jax.random.split(key)

    N, Cin, Cout = 2, 4, 8
    D = H = W = 8
    x = jax.random.normal(kx, (N, Cin, D, H, W), dtype=jnp.float32)

    fan_in = Cin * 3 * 3 * 3
    bound = 1.0 / jnp.sqrt(fan_in)
    weight = jax.random.uniform(kw, (Cout, Cin, 3, 3, 3),
                                minval=-bound, maxval=bound,
                                dtype=jnp.float32)

    fwd = jax.jit(unet_down)
    out = jax.block_until_ready(fwd(x, weight))
    ref = jax.block_until_ready(unet_down_ref(x, weight))

    assert out.shape == (N, Cout, 4, 4, 4), out.shape
    assert jnp.allclose(out, ref, atol=1e-4, rtol=1e-4), \
        float(jnp.max(jnp.abs(out - ref)))
    print("KERNEL_OK")
</pallas_src>

<mosaic_0001>
module attributes {stable_mosaic.version = 11 : i64} {
  func.func @_conv_stats_kernel(%arg0: i32, %arg1: i32, %arg2: i32, %arg3: memref<1x64x128xf32, #tpu.memory_space<vmem>>, %arg4: memref<128x128xf32, #tpu.memory_space<vmem>>, %arg5: memref<1x64x128xf32, #tpu.memory_space<vmem>>, %arg6: memref<1x1x128xf32, #tpu.memory_space<vmem>>, %arg7: memref<1x1x128xf32, #tpu.memory_space<vmem>>, %arg8: memref<64x128xf32, #tpu.memory_space<vmem>>) attributes {dimension_semantics = [#tpu.dimension_semantics<parallel>, #tpu.dimension_semantics<arbitrary>, #tpu.dimension_semantics<arbitrary>], iteration_bounds = array<i64: 2, 1, 1>, scalar_prefetch = 0 : i64, scratch_operands = 1 : i64, tpu.core_type = #tpu.core_type<tc>, window_params = [{transform_indices = @transform_0, window_bounds = array<i64: 1, 64, 128>}, {transform_indices = @transform_1, window_bounds = array<i64: 128, 128>}, {transform_indices = @transform_2, window_bounds = array<i64: 1, 64, 128>}, {transform_indices = @transform_3, window_bounds = array<i64: 1, 1, 128>}, {transform_indices = @transform_4, window_bounds = array<i64: 1, 1, 128>}]} {
    %c0_i32 = arith.constant 0 : i32
    %0 = arith.cmpi eq, %arg2, %c0_i32 : i32
    %1 = arith.extui %0 : i1 to i32
    %c0_i32_0 = arith.constant 0 : i32
    %2 = arith.cmpi ne, %1, %c0_i32_0 : i32
    scf.if %2 {
      %cst_14 = arith.constant 0.000000e+00 : f32
      %18 = vector.broadcast %cst_14 : f32 to vector<64x128xf32>
      %c0_15 = arith.constant 0 : index
      %c0_16 = arith.constant 0 : index
      %19 = vector.load %arg8[%c0_15, %c0_16] : memref<64x128xf32, #tpu.memory_space<vmem>>, vector<64x128xf32>
      tpu.vector_store %arg8[%c0_15, %c0_16], %18 {strides = array<i32>} : memref<64x128xf32, #tpu.memory_space<vmem>>, vector<64x128xf32>,
    } else {
    }
    %c0_i32_1 = arith.constant 0 : i32
    %3 = arith.cmpi eq, %arg1, %c0_i32_1 : i32
    %c0_i32_2 = arith.constant 0 : i32
    %4 = arith.cmpi eq, %arg2, %c0_i32_2 : i32
    %5 = arith.andi %3, %4 : i1
    %6 = arith.extui %5 : i1 to i32
    %c0_i32_3 = arith.constant 0 : i32
    %7 = arith.cmpi ne, %6, %c0_i32_3 : i32
    scf.if %7 {
      %cst_14 = arith.constant 0.000000e+00 : f32
      %18 = vector.broadcast %cst_14 : f32 to vector<1x1x128xf32>
      %c0_15 = arith.constant 0 : index
      %c0_16 = arith.constant 0 : index
      %c0_17 = arith.constant 0 : index
      %19 = vector.load %arg6[%c0_15, %c0_16, %c0_17] : memref<1x1x128xf32, #tpu.memory_space<vmem>>, vector<1x1x128xf32>
      tpu.vector_store %arg6[%c0_15, %c0_16, %c0_17], %18 {strides = array<i32>} : memref<1x1x128xf32, #tpu.memory_space<vmem>>, vector<1x1x128xf32>,
      %cst_18 = arith.constant 0.000000e+00 : f32
      %20 = vector.broadcast %cst_18 : f32 to vector<1x1x128xf32>
      %c0_19 = arith.constant 0 : index
      %c0_20 = arith.constant 0 : index
      %c0_21 = arith.constant 0 : index
      %21 = vector.load %arg7[%c0_19, %c0_20, %c0_21] : memref<1x1x128xf32, #tpu.memory_space<vmem>>, vector<1x1x128xf32>
      tpu.vector_store %arg7[%c0_19, %c0_20, %c0_21], %20 {strides = array<i32>} : memref<1x1x128xf32, #tpu.memory_space<vmem>>, vector<1x1x128xf32>,
    } else {
    }
    %c0 = arith.constant 0 : index
    %c0_4 = arith.constant 0 : index
    %8 = vector.load %arg8[%c0, %c0_4] : memref<64x128xf32, #tpu.memory_space<vmem>>, vector<64x128xf32>
    %c0_5 = arith.constant 0 : index
    %c0_6 = arith.constant 0 : index
    %c0_7 = arith.constant 0 : index
    %9 = vector.load %arg3[%c0_5, %c0_6, %c0_7] : memref<1x64x128xf32, #tpu.memory_space<vmem>>, vector<1x64x128xf32>
    %10 = vector.shape_cast %9 : vector<1x64x128xf32> to vector<64x128xf32>
    %c0_8 = arith.constant 0 : index
    %c0_9 = arith.constant 0 : index
    %11 = vector.load %arg4[%c0_8, %c0_9] : memref<128x128xf32, #tpu.memory_space<vmem>>, vector<128x128xf32>
    %cst = arith.constant dense<0.000000e+00> : vector<64x128xf32>
    %12 = tpu.matmul %10, %11, %cst {dimension_numbers = #tpu.dot_dimension_numbers<[1], [0], [0], [1], [0, 0, 1, 1], [], []>} : vector<64x128xf32>, vector<128x128xf32>, vector<64x128xf32> -> vector<64x128xf32>
    %13 = arith.addf %8, %12 : vector<64x128xf32>
    %c0_10 = arith.constant 0 : index
    %c0_11 = arith.constant 0 : index
    %14 = vector.load %arg8[%c0_10, %c0_11] : memref<64x128xf32, #tpu.memory_space<vmem>>, vector<64x128xf32>
    tpu.vector_store %arg8[%c0_10, %c0_11], %13 {strides = array<i32>} : memref<64x128xf32, #tpu.memory_space<vmem>>, vector<64x128xf32>,
    %c0_i32_12 = arith.constant 0 : i32
    %15 = arith.cmpi eq, %arg2, %c0_i32_12 : i32
    %16 = arith.extui %15 : i1 to i32
    %c0_i32_13 = arith.constant 0 : i32
    %17 = arith.cmpi ne, %16, %c0_i32_13 : i32
    scf.if %17 {
      %c0_14 = arith.constant 0 : index
      %c0_15 = arith.constant 0 : index
      %18 = vector.load %arg8[%c0_14, %c0_15] : memref<64x128xf32, #tpu.memory_space<vmem>>, vector<64x128xf32>
      %c0_16 = arith.constant 0 : index
      %c0_17 = arith.constant 0 : index
      %c0_18 = arith.constant 0 : index
      %19 = vector.load %arg5[%c0_16, %c0_17, %c0_18] : memref<1x64x128xf32, #tpu.memory_space<vmem>>, vector<1x64x128xf32>
      %20 = vector.shape_cast %19 : vector<1x64x128xf32> to vector<64x128xf32>
      %21 = vector.shape_cast %18 : vector<64x128xf32> to vector<1x64x128xf32>
      tpu.vector_store %arg5[%c0_16, %c0_17, %c0_18], %21 {strides = array<i32>} : memref<1x64x128xf32, #tpu.memory_space<vmem>>, vector<1x64x128xf32>,
      %c0_19 = arith.constant 0 : index
      %c0_20 = arith.constant 0 : index
      %c0_21 = arith.constant 0 : index
      %22 = vector.load %arg6[%c0_19, %c0_20, %c0_21] : memref<1x1x128xf32, #tpu.memory_space<vmem>>, vector<1x1x128xf32>
      %23 = vector.shape_cast %22 : vector<1x1x128xf32> to vector<1x128xf32>
      %cst_22 = arith.constant dense<0.000000e+00> : vector<128xf32>
      %24 = vector.multi_reduction <add>, %18, %cst_22 [0] : vector<64x128xf32> to vector<128xf32>
      %25 = vector.shape_cast %24 : vector<128xf32> to vector<1x128xf32>
      %26 = arith.addf %23, %25 : vector<1x128xf32>
      %c0_23 = arith.constant 0 : index
      %c0_24 = arith.constant 0 : index
      %c0_25 = arith.constant 0 : index
      %27 = vector.load %arg6[%c0_23, %c0_24, %c0_25] : memref<1x1x128xf32, #tpu.memory_space<vmem>>, vector<1x1x128xf32>
      %28 = vector.shape_cast %27 : vector<1x1x128xf32> to vector<1x128xf32>
      %29 = vector.shape_cast %26 : vector<1x128xf32> to vector<1x1x128xf32>
      tpu.vector_store %arg6[%c0_23, %c0_24, %c0_25], %29 {strides = array<i32>} : memref<1x1x128xf32, #tpu.memory_space<vmem>>, vector<1x1x128xf32>,
      %c0_26 = arith.constant 0 : index
      %c0_27 = arith.constant 0 : index
      %c0_28 = arith.constant 0 : index
      %30 = vector.load %arg7[%c0_26, %c0_27, %c0_28] : memref<1x1x128xf32, #tpu.memory_space<vmem>>, vector<1x1x128xf32>
      %31 = vector.shape_cast %30 : vector<1x1x128xf32> to vector<1x128xf32>
      %32 = arith.mulf %18, %18 : vector<64x128xf32>
      %cst_29 = arith.constant dense<0.000000e+00> : vector<128xf32>
      %33 = vector.multi_reduction <add>, %32, %cst_29 [0] : vector<64x128xf32> to vector<128xf32>
      %34 = vector.shape_cast %33 : vector<128xf32> to vector<1x128xf32>
      %35 = arith.addf %31, %34 : vector<1x128xf32>
      %c0_30 = arith.constant 0 : index
      %c0_31 = arith.constant 0 : index
      %c0_32 = arith.constant 0 : index
      %36 = vector.load %arg7[%c0_30, %c0_31, %c0_32] : memref<1x1x128xf32, #tpu.memory_space<vmem>>, vector<1x1x128xf32>
      %37 = vector.shape_cast %36 : vector<1x1x128xf32> to vector<1x128xf32>
      %38 = vector.shape_cast %35 : vector<1x128xf32> to vector<1x1x128xf32>
      tpu.vector_store %arg7[%c0_30, %c0_31, %c0_32], %38 {strides = array<i32>} : memref<1x1x128xf32, #tpu.memory_space<vmem>>, vector<1x1x128xf32>,
    } else {
    }
    return
  }
  func.func @transform_0(%arg0: i32, %arg1: i32, %arg2: i32) -> (i32, i32, i32) {
    %c0_i32 = arith.constant 0 : i32
    return %arg0, %arg1, %arg2 : i32, i32, i32
  }
  func.func @transform_1(%arg0: i32, %arg1: i32, %arg2: i32) -> (i32, i32) {
    %c0_i32 = arith.constant 0 : i32
    %c0_i32_0 = arith.constant 0 : i32
    return %arg2, %c0_i32 : i32, i32
  }
  func.func @transform_2(%arg0: i32, %arg1: i32, %arg2: i32) -> (i32, i32, i32) {
    %c0_i32 = arith.constant 0 : i32
    %c0_i32_0 = arith.constant 0 : i32
    return %arg0, %arg1, %c0_i32 : i32, i32, i32
  }
  func.func @transform_3(%arg0: i32, %arg1: i32, %arg2: i32) -> (i32, i32, i32) {
    %c0_i32 = arith.constant 0 : i32
    %c0_i32_0 = arith.constant 0 : i32
    %c0_i32_1 = arith.constant 0 : i32
    return %arg0, %c0_i32, %c0_i32_0 : i32, i32, i32
  }
  func.func @transform_4(%arg0: i32, %arg1: i32, %arg2: i32) -> (i32, i32, i32) {
    %c0_i32 = arith.constant 0 : i32
    %c0_i32_0 = arith.constant 0 : i32
    %c0_i32_1 = arith.constant 0 : i32
    return %arg0, %c0_i32, %c0_i32_0 : i32, i32, i32
  }
}

module attributes {stable_mosaic.version = 11 : i64} {
  func.func @_norm_lrelu_kernel(%arg0: i32, %arg1: i32, %arg2: memref<1x64x128xf32, #tpu.memory_space<vmem>>, %arg3: memref<1x1x128xf32, #tpu.memory_space<vmem>>, %arg4: memref<1x1x128xf32, #tpu.memory_space<vmem>>, %arg5: memref<1x64x128xf32, #tpu.memory_space<vmem>>) attributes {dimension_semantics = [#tpu.dimension_semantics<parallel>, #tpu.dimension_semantics<parallel>], iteration_bounds = array<i64: 2, 1>, scalar_prefetch = 0 : i64, scratch_operands = 0 : i64, tpu.core_type = #tpu.core_type<tc>, window_params = [{transform_indices = @transform_0, window_bounds = array<i64: 1, 64, 128>}, {transform_indices = @transform_1, window_bounds = array<i64: 1, 1, 128>}, {transform_indices = @transform_2, window_bounds = array<i64: 1, 1, 128>}, {transform_indices = @transform_3, window_bounds = array<i64: 1, 64, 128>}]} {
    %c0 = arith.constant 0 : index
    %c0_0 = arith.constant 0 : index
    %c0_1 = arith.constant 0 : index
    %0 = vector.load %arg2[%c0, %c0_0, %c0_1] : memref<1x64x128xf32, #tpu.memory_space<vmem>>, vector<1x64x128xf32>
    %1 = vector.shape_cast %0 : vector<1x64x128xf32> to vector<64x128xf32>
    %c0_2 = arith.constant 0 : index
    %c0_3 = arith.constant 0 : index
    %c0_4 = arith.constant 0 : index
    %2 = vector.load %arg3[%c0_2, %c0_3, %c0_4] : memref<1x1x128xf32, #tpu.memory_space<vmem>>, vector<1x1x128xf32>
    %3 = vector.shape_cast %2 : vector<1x1x128xf32> to vector<1x128xf32>
    %cst = arith.constant 1.562500e-02 : f32
    %4 = vector.broadcast %cst : f32 to vector<1x128xf32>
    %5 = arith.mulf %3, %4 : vector<1x128xf32>
    %c0_5 = arith.constant 0 : index
    %c0_6 = arith.constant 0 : index
    %c0_7 = arith.constant 0 : index
    %6 = vector.load %arg4[%c0_5, %c0_6, %c0_7] : memref<1x1x128xf32, #tpu.memory_space<vmem>>, vector<1x1x128xf32>
    %7 = vector.shape_cast %6 : vector<1x1x128xf32> to vector<1x128xf32>
    %cst_8 = arith.constant 1.562500e-02 : f32
    %8 = vector.broadcast %cst_8 : f32 to vector<1x128xf32>
    %9 = arith.mulf %7, %8 : vector<1x128xf32>
    %10 = arith.mulf %5, %5 : vector<1x128xf32>
    %11 = arith.subf %9, %10 : vector<1x128xf32>
    %cst_9 = arith.constant 0.000000e+00 : f32
    %12 = vector.broadcast %cst_9 : f32 to vector<1x128xf32>
    %13 = arith.maximumf %11, %12 : vector<1x128xf32>
    %cst_10 = arith.constant 9.99999974E-6 : f32
    %14 = vector.broadcast %cst_10 : f32 to vector<1x128xf32>
    %15 = arith.addf %13, %14 : vector<1x128xf32>
    %16 = math.rsqrt %15 : vector<1x128xf32>
    %17 = vector.broadcast %5 : vector<1x128xf32> to vector<64x128xf32>
    %18 = arith.subf %1, %17 : vector<64x128xf32>
    %19 = vector.broadcast %16 : vector<1x128xf32> to vector<64x128xf32>
    %20 = arith.mulf %18, %19 : vector<64x128xf32>
    %cst_11 = arith.constant 0.000000e+00 : f32
    %21 = vector.broadcast %cst_11 : f32 to vector<64x128xf32>
    %22 = arith.cmpf ogt, %20, %21 : vector<64x128xf32>
    %cst_12 = arith.constant 2.000000e-01 : f32
    %23 = vector.broadcast %cst_12 : f32 to vector<64x128xf32>
    %24 = arith.mulf %23, %20 : vector<64x128xf32>
    %25 = arith.select %22, %20, %24 : vector<64x128xi1>, vector<64x128xf32>
    %c0_13 = arith.constant 0 : index
    %c0_14 = arith.constant 0 : index
    %c0_15 = arith.constant 0 : index
    %26 = vector.load %arg5[%c0_13, %c0_14, %c0_15] : memref<1x64x128xf32, #tpu.memory_space<vmem>>, vector<1x64x128xf32>
    %27 = vector.shape_cast %26 : vector<1x64x128xf32> to vector<64x128xf32>
    %28 = vector.shape_cast %25 : vector<64x128xf32> to vector<1x64x128xf32>
    tpu.vector_store %arg5[%c0_13, %c0_14, %c0_15], %28 {strides = array<i32>} : memref<1x64x128xf32, #tpu.memory_space<vmem>>, vector<1x64x128xf32>,
    return
  }
  func.func @transform_0(%arg0: i32, %arg1: i32) -> (i32, i32, i32) {
    %c0_i32 = arith.constant 0 : i32
    %c0_i32_0 = arith.constant 0 : i32
    return %arg0, %arg1, %c0_i32 : i32, i32, i32
  }
  func.func @transform_1(%arg0: i32, %arg1: i32) -> (i32, i32, i32) {
    %c0_i32 = arith.constant 0 : i32
    %c0_i32_0 = arith.constant 0 : i32
    %c0_i32_1 = arith.constant 0 : i32
    return %arg0, %c0_i32, %c0_i32_0 : i32, i32, i32
  }
  func.func @transform_2(%arg0: i32, %arg1: i32) -> (i32, i32, i32) {
    %c0_i32 = arith.constant 0 : i32
    %c0_i32_0 = arith.constant 0 : i32
    %c0_i32_1 = arith.constant 0 : i32
    return %arg0, %c0_i32, %c0_i32_0 : i32, i32, i32
  }
  func.func @transform_3(%arg0: i32, %arg1: i32) -> (i32, i32, i32) {
    %c0_i32 = arith.constant 0 : i32
    %c0_i32_0 = arith.constant 0 : i32
    return %arg0, %arg1, %c0_i32 : i32, i32, i32
  }
}

</mosaic_0001>

<bundles_post_ra>
// kernel: unet_down.3
= control target key start
LH: loop header
LB: loop body
LE: loop exit
PB: predicated region body
PF: predicated region fallthrough
CT: control target
= control target key end

     0   :  { %s503_s12 = smov 0   ;;  %s505_s13 = smov 0   ;;  %s561_s0 = inlined_call_operand.vmem [shape: f32[2,64,128], index: 0, kind: input, shape index: {}, may-alias: {0,3}]   ;;  %s562_s1 = inlined_call_operand.vmem [shape: f32[2,1,128], index: 1, kind: input, shape index: {}]   ;;  %s563_s2 = inlined_call_operand.vmem [shape: f32[2,1,128], index: 2, kind: input, shape index: {}]   ;;  %s564_s3 = inlined_call_operand.vmem [shape: f32[2,64,128], index: 3, kind: output, shape index: {}, may-alias: {0,3}]  }
   0x1   :  { %s507_s14 = smov 0  }
   0x2 LB: > { %s25_s15 = sadd.s32 1, %s477_s13  ;;  %p424_p0 = scmp.ge.s32.totalorder %s481_s14, 1  ;;  %s481_s14 = sphi %s507_s14, %s13_s14   ;;  %s477_s13 = sphi %s505_s13, %s566_s13   ;;  %s473_s12 = sphi %s503_s12, %s565_s12  }
   0x3   : > { %p27_p1 = scmp.ge.s32.totalorder %s25_s15, 2  ;;  %p174_p2 = scmp.lt.s32.totalorder %s481_s14, 3 }
   0x5   : > { %s568_s15 = smov (%p27_p1, %s25_s15), 0  ;;  %p175_p3 = pnand %p424_p0, %p174_p2 }
   0x6   : > { %p213_p4 = scmp.lt.s32.totalorder (!%p175_p3), %s473_s12, 1  ;;  %v256_v5 = vlaneseq (!%p175_p3) }
   0x7   : > { %178 = sbr.rel (%p175_p3) target bundleno = 51 (0x33), region = 32 }
   0x8   : > { %v257_v8 = vshrl.u32 (!%p175_p3), %v256_v5, 7 }
   0xa   : > { %v258_v10 = vsub.s32 (!%p175_p3), 0, %v257_v8 }
   0xe   : > { %s570_s12 = smov (!%p213_p4, %s473_s12), 1 }
   0xf   : > { %s224_s18 = scalar_lea.vmem %s562_s1, %s570_s12  ;;  %s227_s21 = scalar_lea.vmem %s563_s2, %s570_s12 }
  0x10   : > { %v246_v0 = vld [vmem:[%s224_s18] sm:$0x1]  ;;  %s431_s22 = sshll.u32 %s570_s12, 6 }
  0x11   : > { %v247_v1 = vmul.f32 0.015625, %v246_v0  ;;  %v248_v2 = vld [vmem:[%s227_s21] sm:$0x1]  ;;  %s220_s25 = scalar_lea.vmem %s561_s0, %s431_s22  ;;  %s542_s28 = scalar_lea.vmem %s564_s3, %s431_s22 }
  0x12   : > { %v249_v4 = vmul.f32 0.015625, %v248_v2  ;;  %v238_v11 = vld [vmem:[%s220_s25] sm:$0xff]  ;;  %v239_v12 = vld [vmem:[%s220_s25 + $0x8] sm:$0xff]  ;;  %v240_v14 = vld [vmem:[%s220_s25 + $0x10] sm:$0xff] }
  0x13   : > { %v250_v3 = vmul.f32 %v247_v1, %v247_v1  ;;  %v259_v13 = vrot.slane %v247_v1, %v258_v10  ;;  %v241_v15 = vld [vmem:[%s220_s25 + $0x18] sm:$0xff]  ;;  %v242_v16 = vld [vmem:[%s220_s25 + $0x20] sm:$0xff]  ;;  %v243_v17 = vld [vmem:[%s220_s25 + $0x28] sm:$0xff] }
  0x14   : > { %v244_v18 = vld [vmem:[%s220_s25 + $0x30] sm:$0xff]  ;;  %v245_v19 = vld [vmem:[%s220_s25 + $0x38] sm:$0xff] }
  0x15   : > { %v251_v6 = vsub.f32 %v249_v4, %v250_v3  ;;  %v261_v20 = vsub.f32 %v238_v11, %v259_v13  ;;  %v262_v21 = vsub.f32 %v239_v12, %v259_v13  ;;  %v263_v22 = vsub.f32 %v240_v14, %v259_v13 }
  0x16   : > { %v264_v23 = vsub.f32 %v241_v15, %v259_v13  ;;  %v265_v25 = vsub.f32 %v242_v16, %v259_v13  ;;  %v266_v26 = vsub.f32 %v243_v17, %v259_v13  ;;  %v267_v27 = vsub.f32 %v244_v18, %v259_v13 }
  0x17   : > { %v252_v7 = vmax.f32 %v251_v6, 0.0  ;;  %v268_v28 = vsub.f32 %v245_v19, %v259_v13 }
  0x19   : > { %v253_v9 = vadd.f32 1e-05, %v252_v7 }
  0x1b   : > { %457 = vrsqrt.f32 %v253_v9 }
  0x25   : > { %v458_v24 = vpop.eup %457 }
  0x26   : > { %v273_v29 = vrot.slane %v458_v24, %v258_v10 }
  0x28   : > { %v275_v30 = vmul.f32 %v273_v29, %v261_v20  ;;  %v276_v31 = vmul.f32 %v273_v29, %v262_v21  ;;  %v277_v32 = vmul.f32 %v273_v29, %v263_v22  ;;  %v278_v33 = vmul.f32 %v273_v29, %v264_v23 }
  0x29   : > { %v279_v34 = vmul.f32 %v273_v29, %v265_v25  ;;  %v280_v35 = vmul.f32 %v273_v29, %v266_v26  ;;  %v281_v36 = vmul.f32 %v273_v29, %v267_v27  ;;  %v282_v37 = vmul.f32 %v273_v29, %v268_v28 }
  0x2a   : > { %vm283_vm0 = vcmp.gt.f32.partialorder %v275_v30, 0.0  ;;  %v291_v38 = vmul.f32 0.2, %v275_v30  ;;  %vm284_vm1 = vcmp.gt.f32.partialorder %v276_v31, 0.0  ;;  %v292_v39 = vmul.f32 0.2, %v276_v31 }
  0x2b   : > { %vm285_vm2 = vcmp.gt.f32.partialorder %v277_v32, 0.0  ;;  %v293_v40 = vmul.f32 0.2, %v277_v32  ;;  %vm286_vm3 = vcmp.gt.f32.partialorder %v278_v33, 0.0  ;;  %v294_v41 = vmul.f32 0.2, %v278_v33 }
  0x2c   : > { %v299_v42 = vsel %vm283_vm0, %v275_v30, %v291_v38  ;;  %v300_v43 = vsel %vm284_vm1, %v276_v31, %v292_v39  ;;  %vm287_vm4 = vcmp.gt.f32.partialorder %v279_v34, 0.0  ;;  %v295_v44 = vmul.f32 0.2, %v279_v34 }
  0x2d   : > { %307 = vst [vmem:[%s542_s28] sm:$0xff] %v299_v42  ;;  %308 = vst [vmem:[%s542_s28 + $0x8] sm:$0xff] %v300_v43  ;;  %v301_v45 = vsel %vm285_vm2, %v277_v32, %v293_v40  ;;  %v302_v46 = vsel %vm286_vm3, %v278_v33, %v294_v41  ;;  %vm288_vm5 = vcmp.gt.f32.partialorder %v280_v35, 0.0  ;;  %v296_v47 = vmul.f32 0.2, %v280_v35 }
  0x2e   : > { %309 = vst [vmem:[%s542_s28 + $0x10] sm:$0xff] %v301_v45  ;;  %310 = vst [vmem:[%s542_s28 + $0x18] sm:$0xff] %v302_v46  ;;  %v303_v48 = vsel %vm287_vm4, %v279_v34, %v295_v44  ;;  %vm289_vm6 = vcmp.gt.f32.partialorder %v281_v36, 0.0  ;;  %v297_v49 = vmul.f32 0.2, %v281_v36  ;;  %vm290_vm7 = vcmp.gt.f32.partialorder %v282_v37, 0.0 }
  0x2f   : > { %311 = vst [vmem:[%s542_s28 + $0x20] sm:$0xff] %v303_v48  ;;  %v304_v50 = vsel %vm288_vm5, %v280_v35, %v296_v47  ;;  %v298_v51 = vmul.f32 0.2, %v282_v37 }
  0x30   : > { %312 = vst [vmem:[%s542_s28 + $0x28] sm:$0xff] %v304_v50  ;;  %v305_v52 = vsel %vm289_vm6, %v281_v36, %v297_v49 }
  0x31   : > { %313 = vst [vmem:[%s542_s28 + $0x30] sm:$0xff] %v305_v52  ;;  %v306_v53 = vsel %vm290_vm7, %v282_v37, %v298_v51 }
  0x32   : > { %314 = vst [vmem:[%s542_s28 + $0x38] sm:$0xff] %v306_v53 }
  0x33 PF: > { %s13_s14 = sadd.s32 1, %s481_s14   ;;  %s565_s12 = smov %s477_s13 }
  0x34   : > { %p10_p5 = scmp.ge.s32.totalorder %s13_s14, 4   ;;  %s566_s13 = smov %s568_s15 }
  0x36   :  { %12 = sbr.rel (!%p10_p5) target bundleno = 2 (0x2), region = 68 }

// kernel: unet_down.2
= control target key start
LH: loop header
LB: loop body
LE: loop exit
PB: predicated region body
PF: predicated region fallthrough
CT: control target
= control target key end

     0   :  { %s888_s15 = smov 0   ;;  %s890_s16 = smov 0   ;;  %s1004_s0 = inlined_call_operand.vmem [shape: f32[2,64,128], index: 0, kind: input, shape index: {}]   ;;  %s1005_s1 = inlined_call_operand.vmem [shape: f32[128,128], index: 1, kind: input, shape index: {}]   ;;  %s1006_s2 = inlined_call_operand.vmem [shape: f32[2,64,128], index: 2, kind: output, shape index: {0}]   ;;  %s1007_s3 = inlined_call_operand.vmem [shape: f32[2,1,128], index: 3, kind: output, shape index: {1}]   ;;  %s1008_s4 = inlined_call_operand.vmem [shape: f32[2,1,128], index: 4, kind: output, shape index: {2}]  }
   0x1   :  { %s892_s17 = smov 0  }
   0x2 LB: > { %s34_s18 = sadd.s32 1, %s856_s16  ;;  %p688_p0 = scmp.ge.s32.totalorder %s860_s17, 1  ;;  %s860_s17 = sphi %s892_s17, %s15_s17   ;;  %s856_s16 = sphi %s890_s16, %s1010_s16   ;;  %s852_s15 = sphi %s888_s15, %s1009_s15  }
   0x3   : > { %p36_p1 = scmp.ge.s32.totalorder %s34_s18, 2  ;;  %p211_p2 = scmp.lt.s32.totalorder %s860_s17, 3 }
   0x5   : > { %s1012_s18 = smov (%p36_p1, %s34_s18), 0  ;;  %p212_p3 = pnand %p688_p0, %p211_p2 }
   0x6   : > { %v329_v0 = vld [vmem:[%s1005_s1] sm:$0xff] (!%p212_p3)  ;;  %v330_v1 = vld [vmem:[%s1005_s1 + $0x8] sm:$0xff] (!%p212_p3)  ;;  %v331_v2 = vld [vmem:[%s1005_s1 + $0x10] sm:$0xff] (!%p212_p3)  ;;  %p260_p4 = scmp.lt.s32.totalorder (!%p212_p3), %s852_s15, 1  ;;  %v862_v32 = vmov (!%p212_p3), 0.0  }
   0x7   : > { %215 = sbr.rel (%p212_p3) target bundleno = 287 (0x11f), region = 28  ;;  %v765_v3 = vpack.c.bf16 (!%p212_p3), %v330_v1, %v329_v0  ;;  %v332_v4 = vld [vmem:[%s1005_s1 + $0x18] sm:$0xff] (!%p212_p3)  ;;  %v333_v6 = vld [vmem:[%s1005_s1 + $0x20] sm:$0xff] (!%p212_p3)  ;;  %v334_v7 = vld [vmem:[%s1005_s1 + $0x28] sm:$0xff] (!%p212_p3) }
   0x8   : > { %v769_v5 = vpack.c.bf16 (!%p212_p3), %v332_v4, %v331_v2  ;;  %v773_v8 = vpack.c.bf16 (!%p212_p3), %v334_v7, %v333_v6  ;;  %v335_v9 = vld [vmem:[%s1005_s1 + $0x30] sm:$0xff] (!%p212_p3)  ;;  %v336_v10 = vld [vmem:[%s1005_s1 + $0x38] sm:$0xff] (!%p212_p3)  ;;  %v337_v14 = vld [vmem:[%s1005_s1 + $0x40] sm:$0xff] (!%p212_p3) }
   0x9   : > { %766 = vmatprep.subr.bf16.mxu0 (!%p212_p3), %v765_v3  ;;  %797 = vmatprep.subr.bf16.mxu1 (!%p212_p3), %v765_v3  ;;  %v777_v13 = vpack.c.bf16 (!%p212_p3), %v336_v10, %v335_v9  ;;  %v338_v15 = vld [vmem:[%s1005_s1 + $0x48] sm:$0xff] (!%p212_p3)  ;;  %v339_v17 = vld [vmem:[%s1005_s1 + $0x50] sm:$0xff] (!%p212_p3)  ;;  %v340_v18 = vld [vmem:[%s1005_s1 + $0x58] sm:$0xff] (!%p212_p3) }
   0xa   : > { %768 = vmatpush3.bf16.msra.mxu0 (!%p212_p3), %v765_v3  ;;  %805 = vmatpush3.bf16.msra.mxu1 (!%p212_p3), %v765_v3  ;;  %v781_v16 = vpack.c.bf16 (!%p212_p3), %v338_v15, %v337_v14  ;;  %v785_v19 = vpack.c.bf16 (!%p212_p3), %v340_v18, %v339_v17  ;;  %v341_v20 = vld [vmem:[%s1005_s1 + $0x60] sm:$0xff] (!%p212_p3)  ;;  %v342_v21 = vld [vmem:[%s1005_s1 + $0x68] sm:$0xff] (!%p212_p3)  ;;  %v343_v23 = vld [vmem:[%s1005_s1 + $0x70] sm:$0xff] (!%p212_p3) }
   0xb   : > { %770 = vmatprep.subr.bf16.mxu0 (!%p212_p3), %v769_v5  ;;  %798 = vmatprep.subr.bf16.mxu1 (!%p212_p3), %v769_v5  ;;  %v789_v22 = vpack.c.bf16 (!%p212_p3), %v342_v21, %v341_v20  ;;  %v344_v24 = vld [vmem:[%s1005_s1 + $0x78] sm:$0xff] (!%p212_p3) }
   0xc   : > { %v793_v25 = vpack.c.bf16 (!%p212_p3), %v344_v24, %v343_v23 }
   0xe   : > { %s1014_s15 = smov (!%p260_p4, %s852_s15), 1  ;;  %772 = vmatpush3.bf16.msra.mxu0 %v769_v5  ;;  %806 = vmatpush3.bf16.msra.mxu1 %v769_v5 }
   0xf   : > { %s695_s5 = sshll.u32 %s1014_s15, 6  ;;  %774 = vmatprep.subr.bf16.mxu0 %v773_v8  ;;  %799 = vmatprep.subr.bf16.mxu1 %v773_v8  ;;  %s976_s11 = scalar_lea.vmem %s1007_s3, %s1014_s15 }
  0x10   : > { %s932_s8 = scalar_lea.vmem %s1004_s0, %s695_s5  ;;  %s982_s14 = scalar_lea.vmem %s1008_s4, %s1014_s15  ;;  %311 = vst [vmem:[%s976_s11] sm:$0x1] %v862_v32 }
  0x11   : > { %v321_v11 = vld [vmem:[%s932_s8] sm:$0xff]  ;;  %v322_v26 = vld [vmem:[%s932_s8 + $0x8] sm:$0xff]  ;;  %v323_v28 = vld [vmem:[%s932_s8 + $0x10] sm:$0xff]  ;;  %312 = vst [vmem:[%s982_s14] sm:$0x1] %v862_v32  ;;  %s286_s20 = scalar_lea.vmem %s1006_s2, %s695_s5 }
  0x12   : > { %753 = vmatprep.mubr.f32.mxu0 %v321_v11  ;;  %v325_v12 = vld [vmem:[%s932_s8 + $0x20] sm:$0xff]  ;;  %776 = vmatpush3.bf16.msra.mxu0 %v773_v8  ;;  %v326_v27 = vld [vmem:[%s932_s8 + $0x28] sm:$0xff]  ;;  %v327_v29 = vld [vmem:[%s932_s8 + $0x30] sm:$0xff] }
  0x13   : > { %759 = vmatprep.mubr.f32.mxu1 %v325_v12  ;;  %807 = vmatpush3.bf16.msra.mxu1 %v773_v8  ;;  %v324_v30 = vld [vmem:[%s932_s8 + $0x18] sm:$0xff] }
  0x14   : > { %778 = vmatprep.subr.bf16.mxu0 %v777_v13  ;;  %800 = vmatprep.subr.bf16.mxu1 %v777_v13  ;;  %v328_v31 = vld [vmem:[%s932_s8 + $0x38] sm:$0xff] }
  0x16   : > { %780 = vmatpush3.bf16.msra.mxu0 %v777_v13 }
  0x17   : > { %808 = vmatpush3.bf16.msra.mxu1 %v777_v13  ;;  %782 = vmatprep.subr.bf16.mxu0 %v781_v16  ;;  %v485_v8 = vld [vmem:[%s976_s11] sm:$0x1] }
  0x18   : > { %801 = vmatprep.subr.bf16.mxu1 %v781_v16  ;;  %v501_v11 = vld [vmem:[%s982_s14] sm:$0x1] }
  0x1a   : > { %784 = vmatpush3.bf16.msra.mxu0 %v781_v16 }
  0x1b   : > { %809 = vmatpush3.bf16.msra.mxu1 %v781_v16  ;;  %786 = vmatprep.subr.bf16.mxu0 %v785_v19 }
  0x1c   : > { %802 = vmatprep.subr.bf16.mxu1 %v785_v19 }
  0x1e   : > { %788 = vmatpush3.bf16.msra.mxu0 %v785_v19 }
  0x1f   : > { %810 = vmatpush3.bf16.msra.mxu1 %v785_v19  ;;  %790 = vmatprep.subr.bf16.mxu0 %v789_v22 }
  0x20   : > { %803 = vmatprep.subr.bf16.mxu1 %v789_v22 }
  0x22   : > { %792 = vmatpush3.bf16.msra.mxu0 %v789_v22 }
  0x23   : > { %811 = vmatpush3.bf16.msra.mxu1 %v789_v22  ;;  %794 = vmatprep.subr.bf16.mxu0 %v793_v25 }
  0x24   : > { %804 = vmatprep.subr.bf16.mxu1 %v793_v25 }
  0x26   : > { %796 = vmatpush3.bf16.msra.mxu0 %v793_v25 }
  0x27   : > { %812 = vmatpush3.bf16.msra.mxu1 %v793_v25 }
  0x29   : > { %754 = vmatmul.mubr.f32.vlgmr.msra.gmra.mrb[0].mxu0 %v322_v26 }
  0x2a   : > { %760 = vmatmul.mubr.f32.vlgmr.msra.gmra.mrb[0].mxu1 %v326_v27  ;;  %756 = vmatprep.mubr.f32.mxu0 %v323_v28 }
  0x2b   : > { %762 = vmatprep.mubr.f32.mxu1 %v327_v29 }
  0x2d   : > { %757 = vmatmul.mubr.f32.gmra.mrb[2].mxu0 %v324_v30 }
  0x2e   : > { %763 = vmatmul.mubr.f32.gmra.mrb[2].mxu1 %v328_v31 }
  0xfc   : > { %v755_v33 = vpop.f32.mrb[0].mxu0 }
  0xfd   : > { %v761_v34 = vpop.f32.mrb[0].mxu1  ;;  %478 = vst [vmem:[%s286_s20 + $0x8] sm:$0xff] %v755_v33  ;;  %v503_v35 = vmul.f32 %v755_v33, %v755_v33  ;;  %v411_v36 = vpop.f32.mrb[1].mxu0 }
  0xfe   : > { %482 = vst [vmem:[%s286_s20 + $0x28] sm:$0xff] %v761_v34  ;;  %v431_v37 = vpop.f32.mrb[1].mxu1  ;;  %477 = vst [vmem:[%s286_s20] sm:$0xff] %v411_v36  ;;  %v486_v38 = vadd.f32 %v755_v33, %v411_v36  ;;  %v502_v39 = vmul.f32 %v411_v36, %v411_v36  ;;  %v507_v53 = vmul.f32 %v761_v34, %v761_v34 }
  0xff   : > { %481 = vst [vmem:[%s286_s20 + $0x20] sm:$0xff] %v431_v37  ;;  %v506_v50 = vmul.f32 %v431_v37, %v431_v37 }
 0x100   : > { %v510_v40 = vadd.f32 %v503_v35, %v502_v39  ;;  %v758_v41 = vpop.f32.mrb[2].mxu0 }
 0x101   : > { %v764_v42 = vpop.f32.mrb[2].mxu1  ;;  %480 = vst [vmem:[%s286_s20 + $0x18] sm:$0xff] %v758_v41  ;;  %v421_v43 = vpop.f32.mrb[3].mxu0  ;;  %v505_v47 = vmul.f32 %v758_v41, %v758_v41 }
 0x102   : > { %484 = vst [vmem:[%s286_s20 + $0x38] sm:$0xff] %v764_v42  ;;  %v441_v44 = vpop.f32.mrb[3].mxu1  ;;  %479 = vst [vmem:[%s286_s20 + $0x10] sm:$0xff] %v421_v43  ;;  %v487_v45 = vadd.f32 %v486_v38, %v421_v43  ;;  %v504_v46 = vmul.f32 %v421_v43, %v421_v43  ;;  %v509_v59 = vmul.f32 %v764_v42, %v764_v42 }
 0x103   : > { %483 = vst [vmem:[%s286_s20 + $0x30] sm:$0xff] %v441_v44  ;;  %v508_v56 = vmul.f32 %v441_v44, %v441_v44 }
 0x104   : > { %v488_v48 = vadd.f32 %v758_v41, %v487_v45  ;;  %v511_v49 = vadd.f32 %v510_v40, %v504_v46 }
 0x106   : > { %v512_v51 = vadd.f32 %v511_v49, %v505_v47  ;;  %v489_v52 = vadd.f32 %v488_v48, %v431_v37 }
 0x108   : > { %v513_v54 = vadd.f32 %v512_v51, %v506_v50  ;;  %v490_v55 = vadd.f32 %v761_v34, %v489_v52 }
 0x10a   : > { %v491_v57 = vadd.f32 %v490_v55, %v441_v44  ;;  %v514_v58 = vadd.f32 %v513_v54, %v507_v53 }
 0x10c   : > { %v492_v60 = vadd.f32 %v764_v42, %v491_v57  ;;  %v515_v61 = vadd.f32 %v514_v58, %v508_v56 }
 0x10e   : > { %v493_v62 = vrot.slane %v492_v60, 4  ;;  %v516_v63 = vadd.f32 %v515_v61, %v509_v59 }
 0x110   : > { %v494_v0 = vadd.f32 %v493_v62, %v492_v60  ;;  %v517_v1 = vrot.slane %v516_v63, 4 }
 0x112   : > { %v495_v2 = vrot.slane %v494_v0, 2  ;;  %v518_v3 = vadd.f32 %v517_v1, %v516_v63 }
 0x114   : > { %v496_v4 = vadd.f32 %v495_v2, %v494_v0  ;;  %v519_v5 = vrot.slane %v518_v3, 2 }
 0x116   : > { %v497_v6 = vrot.slane %v496_v4, 1  ;;  %v520_v7 = vadd.f32 %v519_v5, %v518_v3 }
 0x118   : > { %v498_v9 = vadd.f32 %v497_v6, %v496_v4  ;;  %v521_v10 = vrot.slane %v520_v7, 1 }
 0x11a   : > { %v499_v12 = vadd.f32 %v498_v9, %v485_v8  ;;  %v522_v13 = vadd.f32 %v521_v10, %v520_v7 }
 0x11c   : > { %500 = vst [vmem:[%s976_s11] sm:$0x1] %v499_v12  ;;  %v523_v14 = vadd.f32 %v522_v13, %v501_v11 }
 0x11e   : > { %524 = vst [vmem:[%s982_s14] sm:$0x1] %v523_v14 }
 0x11f PF: > { %s15_s17 = sadd.s32 1, %s860_s17   ;;  %s1009_s15 = smov %s856_s16 }
 0x120   : > { %p12_p5 = scmp.ge.s32.totalorder %s15_s17, 4   ;;  %s1010_s16 = smov %s1012_s18 }
 0x122   :  { %14 = sbr.rel (!%p12_p5) target bundleno = 2 (0x2), region = 97 }

</bundles_post_ra>
